<compile_context>
chip_gen: v6e
topology: v6e:2x2x1
jax: 0.10.0
libtpu: 0.0.40
codegen_flags: <defaults>
</compile_context>

<pallas_src>
import functools

import jax
import jax.numpy as jnp
from jax import lax
from jax.experimental import pallas as pl
from jax.experimental.pallas import tpu as pltpu


def _round_up(x, m):
    return (x + m - 1) // m * m


def _cdiv(a, b):
    return (a + b - 1) // b


def _choose_tk(H, max_tk):
    """Pick a K tile that divides the reduction extent exactly.

    The reduction axis must never be ragged (garbage along K would corrupt
    real outputs, unlike M/V where garbage only reaches masked stores).
    Returns (tk, Hp) with Hp the (possibly padded) K extent actually used.
    """
    if H <= max_tk:
        return H, H  # single K step; block == full dim is always legal
    start = max_tk - (max_tk % 128)
    for cand in range(start, 0, -128):
        if H % cand == 0:
            return cand, H  # exact tiling, no padding
    # Rare fallback: very large H with no 128-multiple divisor -> pad K.
    return max_tk, _round_up(H, max_tk)


@functools.lru_cache(maxsize=None)
def _vmem_limit_bytes():
    # Leave headroom for Mosaic internal scratch/semaphores; matters most on
    # v7x (64 MiB physical VMEM per TensorCore).
    cap = 64 * 1024 * 1024  # conservative default if the query fails
    try:
        cap = int(pltpu.get_tpu_info().vmem_capacity_bytes)
    except Exception:
        pass
    return max(32 * 1024 * 1024, min(96 * 1024 * 1024, (cap * 3) // 4))


def _linear_kernel(x_ref, w_ref, b_ref, o_ref, acc_ref):
    """o = x @ w.T + b with a float32 VMEM accumulator.

    Grid = (V/tn, M/tm, H/tk). The vocab axis is outermost so the v7x
    TensorCore split lands on vocab even when M has a single block (decode).
    x tile is (tm, tk); w tile is (tn, tk) in the PyTorch [V, H] layout (no
    HBM transpose) -> NT contraction on dim 1 of both operands on the MXU.
    """
    k = pl.program_id(2)

    @pl.when(k == 0)
    def _():
        acc_ref[...] = jnp.zeros_like(acc_ref)

    # TODO(synk): verify in the Mosaic dump that this NT dot_general does not
    # insert vxpose of the W tile; if it ever does, pre-transpose the weight to
    # [H, V] once at init (one-time cost) instead.
    acc_ref[...] += lax.dot_general(
        x_ref[...],
        w_ref[...],
        dimension_numbers=(((1,), (1,)), ((), ())),
        preferred_element_type=jnp.float32,
    )

    @pl.when(k == pl.num_programs(2) - 1)
    def _():
        # bias tile is (1, tn) float32; broadcasts over the tm rows.
        o_ref[...] = (acc_ref[...] + b_ref[...]).astype(o_ref.dtype)


def prepare_weight(weight, compute_dtype=jnp.bfloat16):
    """One-time weight preparation (cast to the kernel's streaming dtype).

    For a multi-GB LM head the per-call cast is a full HBM read+write pass;
    do it once at init / checkpoint load and pass the result to
    `vocab_parallel_linear` so the hot path streams the weight exactly
    ceil(M/tm) times and nothing more.
    """
    return jnp.asarray(weight, compute_dtype)


@functools.partial(
    jax.jit, static_argnames=("tm", "tn", "tk", "compute_dtype", "out_dtype")
)
def vocab_parallel_linear(
    x,
    weight,
    bias=None,
    *,
    tm=512,
    tn=2048,
    tk=2048,
    compute_dtype=jnp.bfloat16,
    out_dtype=None,
):
    """y = x @ weight.T + bias  (PyTorch nn.Linear semantics).

    x:      [batch, seq, hidden]
    weight: [n_vocab, hidden]   (PyTorch layout, used as-is; pass a
                                 `prepare_weight`-cast array to skip the
                                 per-call bf16 cast)
    bias:   [n_vocab] or None
    returns [batch, seq, n_vocab] in out_dtype (defaults to x.dtype; pass
            jnp.bfloat16 to halve logits writeback when downstream allows it)
    """
    B, S, H = x.shape
    V, H2 = weight.shape
    assert H == H2
    out_dtype = x.dtype if out_dtype is None else out_dtype

    M = B * S

    # Tile selection: full-dim blocks for small problems (always legal), big
    # aligned blocks otherwise. No M/V padding and no output slice: Pallas
    # masks ragged-edge loads/stores, and garbage along M/V only ever reaches
    # masked output rows/columns.
    tm = M if M <= tm else tm          # tm default (512) is a multiple of 8
    tn = V if V <= tn else tn          # tn default (2048) is a multiple of 128
    tk, Hp = _choose_tk(H, tk)

    x2d = x.reshape(M, H)
    if x2d.dtype != compute_dtype:
        x2d = x2d.astype(compute_dtype)
    # Skip the weight cast when the caller already prepared it (prepare_weight).
    w = weight if weight.dtype == compute_dtype else weight.astype(compute_dtype)
    if bias is None:
        bias = jnp.zeros((V,), jnp.float32)
    b2d = bias.astype(jnp.float32).reshape(1, V)

    if Hp != H:
        # Rare fallback for hidden sizes with no 128-multiple divisor.
        # TODO(synk): pre-pad the weight once at init for such models; this
        # path re-pads the full weight every call.
        x2d = jnp.pad(x2d, ((0, 0), (0, Hp - H)))
        w = jnp.pad(w, ((0, 0), (0, Hp - H)))

    n_j = _cdiv(V, tn)  # vocab blocks (outermost -> v7x core split on vocab)
    n_i = _cdiv(M, tm)  # token blocks
    n_k = Hp // tk      # reduction steps (exact)
    grid = (n_j, n_i, n_k)

    itemsize_c = jnp.dtype(compute_dtype).itemsize
    cost = pl.CostEstimate(
        flops=2 * M * V * H,
        transcendentals=0,
        bytes_accessed=(
            V * Hp * itemsize_c * n_i        # weight re-streamed per M-block
            + M * Hp * itemsize_c * n_j      # x re-streamed per V-block
            + V * 4 * n_i                    # f32 bias
            + M * V * jnp.dtype(out_dtype).itemsize
        ),
    )

    out2d = pl.pallas_call(
        _linear_kernel,
        out_shape=jax.ShapeDtypeStruct((M, V), out_dtype),
        grid_spec=pltpu.PrefetchScalarGridSpec(
            num_scalar_prefetch=0,
            grid=grid,
            in_specs=[
                pl.BlockSpec((tm, tk), lambda j, i, k: (i, k)),  # x tile
                pl.BlockSpec((tn, tk), lambda j, i, k: (j, k)),  # W tile (NT)
                pl.BlockSpec((1, tn), lambda j, i, k: (0, j)),   # bias tile
            ],
            out_specs=pl.BlockSpec((tm, tn), lambda j, i, k: (i, j)),
            scratch_shapes=[pltpu.VMEM((tm, tn), jnp.float32)],
        ),
        compiler_params=pltpu.CompilerParams(
            dimension_semantics=("parallel", "parallel", "arbitrary"),
            vmem_limit_bytes=_vmem_limit_bytes(),
        ),
        cost_estimate=cost,
    )(x2d, w, b2d)

    return out2d.reshape(B, S, V)


def _reference(x, weight, bias, compute_dtype=jnp.bfloat16):
    # Pure-JAX reference at the same operand precision as the kernel.
    xr = x.astype(compute_dtype).astype(jnp.float32)
    wr = weight.astype(compute_dtype).astype(jnp.float32)
    return jnp.einsum("bsh,vh->bsv", xr, wr) + bias.astype(jnp.float32)


if __name__ == "__main__":
    key = jax.random.PRNGKey(0)

    # Case 1: small, tile-aligned shapes; weight pre-cast once (hot-path mode).
    batch, seq, hidden, n_vocab = 2, 8, 128, 256
    kx, kw, kb, kx2, kw2, kb2 = jax.random.split(key, 6)

    x = jax.random.normal(kx, (batch, seq, hidden), dtype=jnp.float32)
    weight = jax.random.normal(kw, (n_vocab, hidden), dtype=jnp.float32) * 0.02
    bias = jax.random.normal(kb, (n_vocab,), dtype=jnp.float32) * 0.02
    # TODO(synk): `scale` parameter in the PyTorch module is created but never
    # used in forward(), so it is intentionally not applied here.

    w_prepared = prepare_weight(weight)           # one-time bf16 cast
    out = vocab_parallel_linear(x, w_prepared, bias)
    jax.block_until_ready(out)
    ref = _reference(x, weight, bias)
    assert out.shape == (batch, seq, n_vocab)
    assert jnp.allclose(out, ref, atol=1e-2, rtol=1e-2)

    # Case 2: ragged shapes (exercise masked-edge blocks, like real vocab
    # sizes), raw f32 weight (fallback per-call cast path).
    b2, s2, h2, v2 = 1, 5, 96, 1000
    x2 = jax.random.normal(kx2, (b2, s2, h2), dtype=jnp.float32)
    w2 = jax.random.normal(kw2, (v2, h2), dtype=jnp.float32) * 0.02
    bb2 = jax.random.normal(kb2, (v2,), dtype=jnp.float32) * 0.02

    out2 = vocab_parallel_linear(x2, w2, bb2)
    jax.block_until_ready(out2)
    ref2 = _reference(x2, w2, bb2)
    assert out2.shape == (b2, s2, v2)
    assert jnp.allclose(out2, ref2, atol=1e-2, rtol=1e-2)

    print("KERNEL_OK")
</pallas_src>

<mosaic_0001>
module attributes {stable_mosaic.version = 11 : i64} {
  func.func @_linear_kernel(%arg0: i32, %arg1: i32, %arg2: i32, %arg3: memref<16x128xbf16, #tpu.memory_space<vmem>>, %arg4: memref<256x128xbf16, #tpu.memory_space<vmem>>, %arg5: memref<1x256xf32, #tpu.memory_space<vmem>>, %arg6: memref<16x256xf32, #tpu.memory_space<vmem>>, %arg7: memref<16x256xf32, #tpu.memory_space<vmem>>) attributes {dimension_semantics = [#tpu.dimension_semantics<parallel>, #tpu.dimension_semantics<parallel>, #tpu.dimension_semantics<arbitrary>], iteration_bounds = array<i64: 1, 1, 1>, scalar_prefetch = 0 : i64, scratch_operands = 1 : i64, tpu.core_type = #tpu.core_type<tc>, window_params = [{transform_indices = @transform_0, window_bounds = array<i64: 16, 128>}, {transform_indices = @transform_1, window_bounds = array<i64: 256, 128>}, {transform_indices = @transform_2, window_bounds = array<i64: 1, 256>}, {transform_indices = @transform_3, window_bounds = array<i64: 16, 256>}]} {
    %c0_i32 = arith.constant 0 : i32
    %0 = arith.cmpi eq, %arg2, %c0_i32 : i32
    %1 = arith.extui %0 : i1 to i32
    %c0_i32_0 = arith.constant 0 : i32
    %2 = arith.cmpi ne, %1, %c0_i32_0 : i32
    scf.if %2 {
      %cst_10 = arith.constant 0.000000e+00 : f32
      %12 = vector.broadcast %cst_10 : f32 to vector<16x256xf32>
      %c0_11 = arith.constant 0 : index
      %c0_12 = arith.constant 0 : index
      %13 = vector.load %arg7[%c0_11, %c0_12] : memref<16x256xf32, #tpu.memory_space<vmem>>, vector<16x256xf32>
      tpu.vector_store %arg7[%c0_11, %c0_12], %12 {strides = array<i32>} : memref<16x256xf32, #tpu.memory_space<vmem>>, vector<16x256xf32>,
    } else {
    }
    %c0 = arith.constant 0 : index
    %c0_1 = arith.constant 0 : index
    %3 = vector.load %arg7[%c0, %c0_1] : memref<16x256xf32, #tpu.memory_space<vmem>>, vector<16x256xf32>
    %c0_2 = arith.constant 0 : index
    %c0_3 = arith.constant 0 : index
    %4 = vector.load %arg3[%c0_2, %c0_3] : memref<16x128xbf16, #tpu.memory_space<vmem>>, vector<16x128xbf16>
    %c0_4 = arith.constant 0 : index
    %c0_5 = arith.constant 0 : index
    %5 = vector.load %arg4[%c0_4, %c0_5] : memref<256x128xbf16, #tpu.memory_space<vmem>>, vector<256x128xbf16>
    %cst = arith.constant dense<0.000000e+00> : vector<16x256xf32>
    %6 = tpu.matmul %4, %5, %cst {dimension_numbers = #tpu.dot_dimension_numbers<[1], [1], [0], [0], [0, 0, 1, 0], [], []>} : vector<16x128xbf16>, vector<256x128xbf16>, vector<16x256xf32> -> vector<16x256xf32>
    %7 = arith.addf %3, %6 : vector<16x256xf32>
    %c0_6 = arith.constant 0 : index
    %c0_7 = arith.constant 0 : index
    %8 = vector.load %arg7[%c0_6, %c0_7] : memref<16x256xf32, #tpu.memory_space<vmem>>, vector<16x256xf32>
    tpu.vector_store %arg7[%c0_6, %c0_7], %7 {strides = array<i32>} : memref<16x256xf32, #tpu.memory_space<vmem>>, vector<16x256xf32>,
    %c0_i32_8 = arith.constant 0 : i32
    %9 = arith.cmpi eq, %arg2, %c0_i32_8 : i32
    %10 = arith.extui %9 : i1 to i32
    %c0_i32_9 = arith.constant 0 : i32
    %11 = arith.cmpi ne, %10, %c0_i32_9 : i32
    scf.if %11 {
      %c0_10 = arith.constant 0 : index
      %c0_11 = arith.constant 0 : index
      %12 = vector.load %arg7[%c0_10, %c0_11] : memref<16x256xf32, #tpu.memory_space<vmem>>, vector<16x256xf32>
      %c0_12 = arith.constant 0 : index
      %c0_13 = arith.constant 0 : index
      %13 = vector.load %arg5[%c0_12, %c0_13] : memref<1x256xf32, #tpu.memory_space<vmem>>, vector<1x256xf32>
      %14 = vector.broadcast %13 : vector<1x256xf32> to vector<16x256xf32>
      %15 = arith.addf %12, %14 : vector<16x256xf32>
      %c0_14 = arith.constant 0 : index
      %c0_15 = arith.constant 0 : index
      %16 = vector.load %arg6[%c0_14, %c0_15] : memref<16x256xf32, #tpu.memory_space<vmem>>, vector<16x256xf32>
      tpu.vector_store %arg6[%c0_14, %c0_15], %15 {strides = array<i32>} : memref<16x256xf32, #tpu.memory_space<vmem>>, vector<16x256xf32>,
    } else {
    }
    return
  }
  func.func @transform_0(%arg0: i32, %arg1: i32, %arg2: i32) -> (i32, i32) {
    %c0_i32 = arith.constant 0 : i32
    return %arg1, %arg2 : i32, i32
  }
  func.func @transform_1(%arg0: i32, %arg1: i32, %arg2: i32) -> (i32, i32) {
    %c0_i32 = arith.constant 0 : i32
    return %arg0, %arg2 : i32, i32
  }
  func.func @transform_2(%arg0: i32, %arg1: i32, %arg2: i32) -> (i32, i32) {
    %c0_i32 = arith.constant 0 : i32
    %c0_i32_0 = arith.constant 0 : i32
    return %c0_i32, %arg0 : i32, i32
  }
  func.func @transform_3(%arg0: i32, %arg1: i32, %arg2: i32) -> (i32, i32) {
    %c0_i32 = arith.constant 0 : i32
    return %arg1, %arg0 : i32, i32
  }
}

</mosaic_0001>

<bundles_post_ra>
// kernel: vocab_parallel_linear.1
= control target key start
LH: loop header
LB: loop body
LE: loop exit
PB: predicated region body
PF: predicated region fallthrough
CT: control target
= control target key end

     0   :  { %8 = vsyncpa [#allocation4], 0  ;;  %s413_s0 = inlined_call_operand.vmem [shape: bf16[16,128], index: 0, kind: input, shape index: {}]   ;;  %s414_s1 = inlined_call_operand.hbm [shape: bf16[256,128], index: 1, kind: input, shape index: {}]   ;;  %s415_s2 = inlined_call_operand.vmem [shape: f32[1,256], index: 2, kind: input, shape index: {}]   ;;  %s416_s3 = inlined_call_operand.hbm [shape: f32[16,256], index: 3, kind: output, shape index: {}]  }
   0x1   :  { %9 = vsyncpa [#allocation5], 0  ;;  %s375_s12 = smov [#allocation3]  }
   0x2   :  { %s17_s13 = sshll.u32 %s375_s12, 4  ;;  %s18_s13 = int_to_ptr.vmem [resolvable:$true] %s17_s13 }
   0x3   :  { %s339_s14 = scalar_lea.vmem %s18_s13, 2048  ;;  %p344_p1 = scmp.lt.s32.totalorder %s18_s13, %s18_s13 }
   0x4   :  { %p340_p0 = scmp.ne.s32.totalorder %s18_s13, %s339_s14  ;;  %p345_p2 = scmp.lt.s32.totalorder %s339_s14, %s339_s14 }
   0x6   :  { %p346_p3 = por %p345_p2, %p344_p1 }
   0x8   :  { %p347_p4 = pnand %p346_p3, %p340_p0 }
   0xa   :  { %350 = shalt.err (!%p347_p4)
}
   0xb   :  { %s376_s15 = smov 64   ;;  %s377_s16 = smov 4  }
   0xc   :  { %23 = dma.hbm_to_vmem [thread:$0]  %s414_s1, 2048, %s18_s13, [#allocation4], %s376_s15, %s376_s15, %s377_s16  }
   0xd   :  { %371 = dma.done.wait [#allocation4], 2048  }
   0xe   :  { %372 = vsyncadd [#allocation4], 4294965248  ;;  %v314_v0 = vld [vmem:[#allocation3 + $0x78] sm:$0xff]   ;;  %v316_v2 = vld [vmem:[#allocation3 + $0x70] sm:$0xff]   ;;  %v238_v17 = vlaneseq  ;;  %s378_s21 = smov [#allocation6]  }
   0xf   :  { %v315_v1 = vld [vmem:[#allocation3 + $0x38] sm:$0xff]   ;;  %290 = vmatprep.subr.bf16.mxu0 %v314_v0  ;;  %v317_v3 = vld [vmem:[#allocation3 + $0x30] sm:$0xff]   ;;  %v318_v4 = vld [vmem:[#allocation3 + $0x68] sm:$0xff]   ;;  %s261_s22 = sshll.u32 %s378_s21, 4  ;;  %s262_s22 = int_to_ptr.vmem [resolvable:$true] %s261_s22 }
  0x10   :  { %291 = vmatpush3.bf16.xpose.msra.mxu0 %v315_v1  ;;  %v319_v5 = vld [vmem:[#allocation3 + $0x28] sm:$0xff]   ;;  %v320_v6 = vld [vmem:[#allocation3 + $0x60] sm:$0xff]   ;;  %v322_v9 = vld [vmem:[#allocation3 + $0x58] sm:$0xff]   ;;  %v239_v18 = vshrl.u32 %v238_v17, 7  ;;  %s351_s23 = scalar_lea.vmem %s262_s22, 512  ;;  %p356_p6 = scmp.lt.s32.totalorder %s262_s22, %s262_s22 }
  0x11   :  { %292 = vmatprep.subr.bf16.mxu0 %v316_v2  ;;  %v330_v7 = vld [vmem:[%s413_s0] sm:$0xff]   ;;  %v323_v10 = vld [vmem:[#allocation3 + $0x18] sm:$0xff]   ;;  %v324_v11 = vld [vmem:[#allocation3 + $0x50] sm:$0xff]   ;;  %p352_p5 = scmp.ne.s32.totalorder %s262_s22, %s351_s23  ;;  %p357_p7 = scmp.lt.s32.totalorder %s351_s23, %s351_s23 }
  0x12   :  { %306 = vmatprep.mubr.bf16.mxu0 %v330_v7  ;;  %v321_v8 = vld [vmem:[#allocation3 + $0x20] sm:$0xff]   ;;  %v325_v12 = vld [vmem:[#allocation3 + $0x10] sm:$0xff]   ;;  %v326_v13 = vld [vmem:[#allocation3 + $0x48] sm:$0xff]   ;;  %v240_v19 = vsub.s32 0, %v239_v18  ;;  %v244_v21 = vsub.s32 1, %v239_v18 }
  0x13   :  { %v327_v14 = vld [vmem:[#allocation3 + $0x8] sm:$0xff]   ;;  %v328_v15 = vld [vmem:[#allocation3 + $0x40] sm:$0xff]   ;;  %p358_p8 = por %p357_p7, %p356_p6 }
  0x14   :  { %v329_v16 = vld [vmem:[#allocation3] sm:$0xff]  }
  0x15   :  { %v236_v20 = vld [vmem:[%s415_s2] sm:$0x3]  ;;  %p359_p9 = pnand %p358_p8, %p352_p5 }
  0x16   :  { %v241_v22 = vrot.slane %v236_v20, %v240_v19  ;;  %v245_v23 = vrot.slane %v236_v20, %v244_v21 }
  0x18   :  { %293 = vmatpush3.bf16.xpose.msra.mxu0 %v317_v3 }
  0x19   :  { %294 = vmatprep.subr.bf16.mxu0 %v318_v4 }
  0x20   :  { %295 = vmatpush3.bf16.xpose.msra.mxu0 %v319_v5 }
  0x21   :  { %296 = vmatprep.subr.bf16.mxu0 %v320_v6 }
  0x28   :  { %297 = vmatpush3.bf16.xpose.msra.mxu0 %v321_v8 }
  0x29   :  { %298 = vmatprep.subr.bf16.mxu0 %v322_v9 }
  0x30   :  { %299 = vmatpush3.bf16.xpose.msra.mxu0 %v323_v10 }
  0x31   :  { %300 = vmatprep.subr.bf16.mxu0 %v324_v11 }
  0x38   :  { %301 = vmatpush3.bf16.xpose.msra.mxu0 %v325_v12 }
  0x39   :  { %302 = vmatprep.subr.bf16.mxu0 %v326_v13 }
  0x40   :  { %303 = vmatpush3.bf16.xpose.msra.mxu0 %v327_v14 }
  0x41   :  { %304 = vmatprep.subr.bf16.mxu0 %v328_v15 }
  0x48   :  { %305 = vmatpush3.bf16.xpose.msra.mxu0 %v329_v16 }
  0x4f   :  { %307 = vmatmul.mubr.bf16.vlgmr.msra.gmra.mxu0 %v330_v7 }
 0x10f   :  { %v212_v24 = vpop.f32.mrf.mxu0 }
 0x110   :  { %v248_v25 = vadd.f32 %v241_v22, %v212_v24 }
 0x111   :  { %v214_v26 = vpop.f32.mrf.mxu0 }
 0x112   :  { %252 = vst [vmem:[#allocation6] sm:$0xff] %v248_v25  ;;  %v249_v27 = vadd.f32 %v245_v23, %v214_v26 }
 0x113   :  { %v216_v28 = vpop.f32.mrf.mxu0 }
 0x114   :  { %253 = vst [vmem:[#allocation6 + $0x8] sm:$0xff] %v249_v27  ;;  %v250_v29 = vadd.f32 %v241_v22, %v216_v28 }
 0x115   :  { %v218_v30 = vpop.f32.mrf.mxu0 }
 0x116   :  { %254 = vst [vmem:[#allocation6 + $0x10] sm:$0xff] %v250_v29  ;;  %v251_v31 = vadd.f32 %v245_v23, %v218_v30 }
 0x118   :  { %255 = vst [vmem:[#allocation6 + $0x18] sm:$0xff] %v251_v31 }
 0x119   :  { %362 = shalt.err (!%p359_p9)
}
 0x11a   :  { %s379_s2 = smov 256   ;;  %s380_s24 = smov 16  }
 0x11b   :  { %267 = dma.vmem_to_hbm [thread:$0]  %s262_s22, 512, %s416_s3, [#allocation5], %s379_s2, %s379_s2, %s380_s24  }
 0x11c   :  { %373 = dma.done.wait [#allocation5], 512  }
 0x11d   :  { %374 = vsyncadd [#allocation5], 4294966784 }
 0x11e   :  { %271 = vsyncpa [#allocation4], 1 }
 0x11f   :  { %272 = vsyncpa [#allocation5], 1 }

</bundles_post_ra>
